<compile_context>
chip_gen: v5e
topology: v5e:2x2
jax: 0.10.0
libtpu: 0.0.40
codegen_flags: <defaults>
</compile_context>

<pallas_src>
import functools
import math

import jax
import jax.numpy as jnp
from jax.experimental import pallas as pl
from jax.experimental.pallas import tpu as pltpu

NEAR_INF = 1e20


def _round_up(x, m):
    return (x + m - 1) // m * m


def _output_layer_kernel(x_ref, w_o2e_ref, b_o2e_ref, w_ref, b_ref, out_ref,
                         e_scratch, *, tile_n, padding_idx):
    # x_ref:     (TM, H)   bf16  rows of flattened input for this M tile
    # w_o2e_ref: (E, H)    bf16  o2e Linear weight (PyTorch layout)
    # b_o2e_ref: (1, E)    f32   o2e Linear bias
    # w_ref:     (TN, E)   bf16  tile of the final projection weight
    # b_ref:     (1, TN)   f32   tile of the final bias
    # out_ref:   (TM, TN)  f32
    # e_scratch: (TM, E)   bf16  hoisted o2e output, persists across vocab tiles
    j = pl.program_id(1)

    # Hoist the o2e projection: compute e = x @ W_o2e^T + b_o2e once per M tile
    # (first vocab tile only) and reuse for every subsequent vocab tile.
    @pl.when(j == 0)
    def _():
        e = jax.lax.dot_general(
            x_ref[...], w_o2e_ref[...],
            dimension_numbers=(((1,), (1,)), ((), ())),  # contract H with H
            preferred_element_type=jnp.float32,
        )
        e = e + b_o2e_ref[...]
        e_scratch[...] = e.astype(e_scratch.dtype)

    # scores tile = e @ W_tile^T + bias_tile   (bf16 operands, f32 accumulate)
    s = jax.lax.dot_general(
        e_scratch[...], w_ref[...],
        dimension_numbers=(((1,), (1,)), ((), ())),      # contract E with E
        preferred_element_type=jnp.float32,
    )
    s = s + b_ref[...]

    if padding_idx >= 0:
        # Fused padding mask: global column index of this tile's columns.
        col = jax.lax.broadcasted_iota(jnp.int32, s.shape, 1) + j * tile_n
        s = jnp.where(col == padding_idx, -NEAR_INF, s)

    out_ref[...] = s.astype(out_ref.dtype)


def output_layer_forward(x, w_o2e, b_o2e, weight, bias, padding_idx=-1,
                         tile_m=256, tile_n=512):
    """x: (bsz, seqlen, hid) -> scores: (bsz, seqlen, num_features)."""
    bsz, seqlen, hid = x.shape
    num_features, emb = weight.shape
    assert w_o2e.shape == (emb, hid)
    assert b_o2e.shape == (emb,)
    assert bias.shape == (num_features,)

    M = bsz * seqlen

    # Pad rows to a sublane multiple and vocab to a lane-tile multiple so every
    # block is (8, 128)-aligned and all output stores are unmasked/lane-dense.
    tile_m = min(tile_m, _round_up(M, 8))
    tile_n = min(tile_n, _round_up(num_features, 128))
    M_pad = _round_up(M, tile_m)
    N_pad = _round_up(num_features, tile_n)

    # bf16 operands (MXU-friendly, halves the dominant weight HBM stream);
    # accumulation and bias adds stay f32.
    x2 = jnp.pad(x.reshape(M, hid), ((0, M_pad - M), (0, 0))).astype(jnp.bfloat16)
    w_o2e_b = w_o2e.astype(jnp.bfloat16)
    b_o2e_2d = b_o2e.reshape(1, emb).astype(jnp.float32)
    w_b = jnp.pad(weight, ((0, N_pad - num_features), (0, 0))).astype(jnp.bfloat16)
    bias_2d = jnp.pad(bias, (0, N_pad - num_features)).reshape(1, N_pad).astype(jnp.float32)

    grid_m = M_pad // tile_m
    grid_n = N_pad // tile_n
    grid = (grid_m, grid_n)

    # VMEM budget: double-buffered tiles + the hoisted e scratch, with headroom.
    vmem_bytes = 2 * (tile_m * hid * 2 + emb * hid * 2 + emb * 4
                      + tile_n * emb * 2 + tile_n * 4 + tile_m * tile_n * 4)
    vmem_bytes += tile_m * emb * 2
    vmem_limit = int(min(max(vmem_bytes + (8 << 20), 32 << 20), 64 << 20))

    cost = pl.CostEstimate(
        flops=2 * M_pad * hid * emb + 2 * M_pad * emb * N_pad,
        transcendentals=0,
        bytes_accessed=(M_pad * hid * 2 + emb * hid * 2 + emb * 4
                        + grid_m * (N_pad * emb * 2 + N_pad * 4)
                        + M_pad * N_pad * 4),
    )

    kernel = functools.partial(_output_layer_kernel, tile_n=tile_n,
                               padding_idx=int(padding_idx))

    scores2 = pl.pallas_call(
        kernel,
        out_shape=jax.ShapeDtypeStruct((M_pad, N_pad), jnp.float32),
        grid_spec=pltpu.PrefetchScalarGridSpec(
            num_scalar_prefetch=0,
            grid=grid,
            in_specs=[
                pl.BlockSpec((tile_m, hid), lambda i, j: (i, 0)),   # x rows (per M tile)
                pl.BlockSpec((emb, hid), lambda i, j: (0, 0)),      # o2e weight (full)
                pl.BlockSpec((1, emb), lambda i, j: (0, 0)),        # o2e bias (full)
                pl.BlockSpec((tile_n, emb), lambda i, j: (j, 0)),   # vocab weight tile
                pl.BlockSpec((1, tile_n), lambda i, j: (0, j)),     # vocab bias tile
            ],
            out_specs=pl.BlockSpec((tile_m, tile_n), lambda i, j: (i, j)),
            scratch_shapes=[pltpu.VMEM((tile_m, emb), jnp.bfloat16)],
        ),
        compiler_params=pltpu.CompilerParams(
            dimension_semantics=("parallel", "arbitrary"),
            vmem_limit_bytes=vmem_limit,
        ),
        cost_estimate=cost,
    )(x2, w_o2e_b, b_o2e_2d, w_b, bias_2d)

    scores = scores2[:M, :num_features].reshape(bsz, seqlen, num_features)

    # TODO(synk): dropout is identity here (p=0 / eval mode); numsoftmax>1
    # (mixture of softmaxes) path is not exercised by this configuration.
    return scores


if __name__ == "__main__":
    # Small shapes consistent with the module's forward.
    bsz, seqlen = 2, 8
    hiddensize = 32
    embeddingsize = 64
    num_features = 256  # number of candidates

    key = jax.random.PRNGKey(0)
    k_x, k_w, k_b, k_wo, k_bo = jax.random.split(key, 5)

    # Deterministic parameter init mirroring __init__ distributions.
    rng = 1.0 / math.sqrt(num_features)
    bias = jax.random.uniform(k_b, (num_features,), jnp.float32, -rng, rng)
    weight = jax.random.normal(k_w, (num_features, embeddingsize), jnp.float32)

    # o2e = nn.Linear(hiddensize, embeddingsize): default torch init ~ U(-1/sqrt(fan_in), ..)
    lim = 1.0 / math.sqrt(hiddensize)
    w_o2e = jax.random.uniform(k_wo, (embeddingsize, hiddensize), jnp.float32, -lim, lim)
    b_o2e = jax.random.uniform(k_bo, (embeddingsize,), jnp.float32, -lim, lim)

    x = jax.random.normal(k_x, (bsz, seqlen, hiddensize), jnp.float32)

    # Reference matching the kernel arithmetic (bf16 operands, f32 accumulate).
    x2 = x.reshape(-1, hiddensize).astype(jnp.bfloat16)
    e_ref = jax.lax.dot_general(x2, w_o2e.astype(jnp.bfloat16),
                                (((1,), (1,)), ((), ())),
                                preferred_element_type=jnp.float32) + b_o2e
    e_ref = e_ref.astype(jnp.bfloat16)
    ref = jax.lax.dot_general(e_ref, weight.astype(jnp.bfloat16),
                              (((1,), (1,)), ((), ())),
                              preferred_element_type=jnp.float32) + bias
    ref = ref.reshape(bsz, seqlen, num_features)

    # Case 1: no padding masking.
    scores = output_layer_forward(x, w_o2e, b_o2e, weight, bias, padding_idx=-1)
    scores = jax.block_until_ready(scores)
    assert scores.shape == (bsz, seqlen, num_features)
    assert jnp.allclose(scores, ref, atol=2e-2, rtol=2e-2)

    # Loose sanity check against the pure-f32 PyTorch-equivalent reference.
    ref_f32 = (x @ w_o2e.T + b_o2e) @ weight.T + bias
    assert jnp.allclose(scores, ref_f32, atol=0.2, rtol=0.1)

    # Case 2: padding_idx masking fused inside the kernel.
    pad_idx = 3
    scores_p = output_layer_forward(x, w_o2e, b_o2e, weight, bias, padding_idx=pad_idx)
    scores_p = jax.block_until_ready(scores_p)
    ref_p = ref.at[:, :, pad_idx].set(-NEAR_INF)
    assert jnp.allclose(scores_p, ref_p, atol=2e-2, rtol=2e-2)

    print("KERNEL_OK")
</pallas_src>

<mosaic_0001>
module attributes {stable_mosaic.version = 11 : i64} {
  func.func @_output_layer_kernel(%arg0: i32, %arg1: i32, %arg2: memref<16x32xbf16, #tpu.memory_space<vmem>>, %arg3: memref<64x32xbf16, #tpu.memory_space<vmem>>, %arg4: memref<1x64xf32, #tpu.memory_space<vmem>>, %arg5: memref<256x64xbf16, #tpu.memory_space<vmem>>, %arg6: memref<1x256xf32, #tpu.memory_space<vmem>>, %arg7: memref<16x256xf32, #tpu.memory_space<vmem>>, %arg8: memref<16x64xbf16, #tpu.memory_space<vmem>>) attributes {dimension_semantics = [#tpu.dimension_semantics<parallel>, #tpu.dimension_semantics<arbitrary>], iteration_bounds = array<i64: 1, 1>, scalar_prefetch = 0 : i64, scratch_operands = 1 : i64, tpu.core_type = #tpu.core_type<tc>, window_params = [{transform_indices = @transform_0, window_bounds = array<i64: 16, 32>}, {pipeline_mode = #tpu.pipeline_mode<synchronous>, transform_indices = @transform_1, window_bounds = array<i64: 64, 32>}, {pipeline_mode = #tpu.pipeline_mode<synchronous>, transform_indices = @transform_2, window_bounds = array<i64: 1, 64>}, {transform_indices = @transform_3, window_bounds = array<i64: 256, 64>}, {transform_indices = @transform_4, window_bounds = array<i64: 1, 256>}, {transform_indices = @transform_5, window_bounds = array<i64: 16, 256>}]} {
    %c0_i32 = arith.constant 0 : i32
    %0 = arith.cmpi eq, %arg1, %c0_i32 : i32
    %1 = arith.extui %0 : i1 to i32
    %c0_i32_0 = arith.constant 0 : i32
    %2 = arith.cmpi ne, %1, %c0_i32_0 : i32
    scf.if %2 {
      %c0_8 = arith.constant 0 : index
      %c0_9 = arith.constant 0 : index
      %10 = vector.load %arg2[%c0_8, %c0_9] : memref<16x32xbf16, #tpu.memory_space<vmem>>, vector<16x32xbf16>
      %c0_10 = arith.constant 0 : index
      %c0_11 = arith.constant 0 : index
      %11 = vector.load %arg3[%c0_10, %c0_11] : memref<64x32xbf16, #tpu.memory_space<vmem>>, vector<64x32xbf16>
      %cst_12 = arith.constant dense<0.000000e+00> : vector<16x64xf32>
      %12 = tpu.matmul %10, %11, %cst_12 {dimension_numbers = #tpu.dot_dimension_numbers<[1], [1], [0], [0], [0, 0, 1, 0], [], []>} : vector<16x32xbf16>, vector<64x32xbf16>, vector<16x64xf32> -> vector<16x64xf32>
      %c0_13 = arith.constant 0 : index
      %c0_14 = arith.constant 0 : index
      %13 = vector.load %arg4[%c0_13, %c0_14] : memref<1x64xf32, #tpu.memory_space<vmem>>, vector<1x64xf32>
      %14 = vector.broadcast %13 : vector<1x64xf32> to vector<16x64xf32>
      %15 = arith.addf %12, %14 : vector<16x64xf32>
      %16 = arith.truncf %15 : vector<16x64xf32> to vector<16x64xbf16>
      %c0_15 = arith.constant 0 : index
      %c0_16 = arith.constant 0 : index
      %17 = vector.load %arg8[%c0_15, %c0_16] : memref<16x64xbf16, #tpu.memory_space<vmem>>, vector<16x64xbf16>
      tpu.vector_store %arg8[%c0_15, %c0_16], %16 {strides = array<i32>} : memref<16x64xbf16, #tpu.memory_space<vmem>>, vector<16x64xbf16>,
    } else {
    }
    %c0 = arith.constant 0 : index
    %c0_1 = arith.constant 0 : index
    %3 = vector.load %arg8[%c0, %c0_1] : memref<16x64xbf16, #tpu.memory_space<vmem>>, vector<16x64xbf16>
    %c0_2 = arith.constant 0 : index
    %c0_3 = arith.constant 0 : index
    %4 = vector.load %arg5[%c0_2, %c0_3] : memref<256x64xbf16, #tpu.memory_space<vmem>>, vector<256x64xbf16>
    %cst = arith.constant dense<0.000000e+00> : vector<16x256xf32>
    %5 = tpu.matmul %3, %4, %cst {dimension_numbers = #tpu.dot_dimension_numbers<[1], [1], [0], [0], [0, 0, 1, 0], [], []>} : vector<16x64xbf16>, vector<256x64xbf16>, vector<16x256xf32> -> vector<16x256xf32>
    %c0_4 = arith.constant 0 : index
    %c0_5 = arith.constant 0 : index
    %6 = vector.load %arg6[%c0_4, %c0_5] : memref<1x256xf32, #tpu.memory_space<vmem>>, vector<1x256xf32>
    %7 = vector.broadcast %6 : vector<1x256xf32> to vector<16x256xf32>
    %8 = arith.addf %5, %7 : vector<16x256xf32>
    %c0_6 = arith.constant 0 : index
    %c0_7 = arith.constant 0 : index
    %9 = vector.load %arg7[%c0_6, %c0_7] : memref<16x256xf32, #tpu.memory_space<vmem>>, vector<16x256xf32>
    tpu.vector_store %arg7[%c0_6, %c0_7], %8 {strides = array<i32>} : memref<16x256xf32, #tpu.memory_space<vmem>>, vector<16x256xf32>,
    return
  }
  func.func @transform_0(%arg0: i32, %arg1: i32) -> (i32, i32) {
    %c0_i32 = arith.constant 0 : i32
    %c0_i32_0 = arith.constant 0 : i32
    return %arg0, %c0_i32 : i32, i32
  }
  func.func @transform_1(%arg0: i32, %arg1: i32) -> (i32, i32) {
    %c0_i32 = arith.constant 0 : i32
    %c0_i32_0 = arith.constant 0 : i32
    %c0_i32_1 = arith.constant 0 : i32
    return %c0_i32, %c0_i32_0 : i32, i32
  }
  func.func @transform_2(%arg0: i32, %arg1: i32) -> (i32, i32) {
    %c0_i32 = arith.constant 0 : i32
    %c0_i32_0 = arith.constant 0 : i32
    %c0_i32_1 = arith.constant 0 : i32
    return %c0_i32, %c0_i32_0 : i32, i32
  }
  func.func @transform_3(%arg0: i32, %arg1: i32) -> (i32, i32) {
    %c0_i32 = arith.constant 0 : i32
    %c0_i32_0 = arith.constant 0 : i32
    return %arg1, %c0_i32 : i32, i32
  }
  func.func @transform_4(%arg0: i32, %arg1: i32) -> (i32, i32) {
    %c0_i32 = arith.constant 0 : i32
    %c0_i32_0 = arith.constant 0 : i32
    return %c0_i32, %arg1 : i32, i32
  }
  func.func @transform_5(%arg0: i32, %arg1: i32) -> (i32, i32) {
    %c0_i32 = arith.constant 0 : i32
    return %arg0, %arg1 : i32, i32
  }
}

</mosaic_0001>

<bundles_post_ra>
// kernel: tpu_custom_call.1
= control target key start
LH: loop header
LB: loop body
LE: loop exit
PB: predicated region body
PF: predicated region fallthrough
CT: control target
= control target key end

     0   :  { %vm65_vm0 = vcmask 261120   ;;  %vm225_vm1 = vcmask 523264   ;;  %s598_s0 = inlined_call_operand.vmem [shape: bf16[16,32], index: 0, kind: input, shape index: {}]   ;;  %s599_s1 = inlined_call_operand.vmem [shape: bf16[64,32], index: 1, kind: input, shape index: {}]   ;;  %s600_s2 = inlined_call_operand.vmem [shape: f32[1,64], index: 2, kind: input, shape index: {}]   ;;  %s601_s3 = inlined_call_operand.vmem [shape: bf16[256,64], index: 3, kind: input, shape index: {}]   ;;  %s602_s4 = inlined_call_operand.vmem [shape: f32[1,256], index: 4, kind: input, shape index: {}]   ;;  %s603_s5 = inlined_call_operand.hbm [shape: f32[16,256], index: 5, kind: output, shape index: {}]  }
   0x1   :  { %v422_v0 = vld [vmem:[%s599_s1 + $0x18] sm:$0xff]  ;;  %v421_v4 = vld [vmem:[%s599_s1 + $0x10] sm:$0xff] }
   0x2   :  { %v79_v1 = vsel %vm65_vm0, %v422_v0, 0  ;;  %v431_v2 = vld [vmem:[%s601_s3 + $0x38] sm:$0xff]  ;;  %v430_v7 = vld [vmem:[%s601_s3 + $0x30] sm:$0xff] }
   0x3   :  { %v439_v3 = vld [vmem:[%s601_s3 + $0x78] sm:$0xff]  ;;  %85 = vmatpush.bf16.xpose.msra.mxu0 %v79_v1  ;;  %v251_v5 = vsel %vm225_vm1, %v431_v2, 0  ;;  %v438_v8 = vld [vmem:[%s601_s3 + $0x70] sm:$0xff] }
   0x4   :  { %v275_v6 = vsel %vm225_vm1, %v439_v3, 0  ;;  %277 = vmatpush.bf16.xpose.msra.mxu1 %v251_v5 }
   0x5   :  { %291 = vmatpush.bf16.xpose.msra.mxu2 %v275_v6 }
   0x6   :  { %10 = vsyncpa [#allocation4], 0  ;;  %v76_v9 = vsel %vm65_vm0, %v421_v4, 0  ;;  %v248_v10 = vsel %vm225_vm1, %v430_v7, 0  ;;  %v272_v11 = vsel %vm225_vm1, %v438_v8, 0  ;;  %v420_v12 = vld [vmem:[%s599_s1 + $0x8] sm:$0xff] }
   0x7   :  { %v429_v13 = vld [vmem:[%s601_s3 + $0x28] sm:$0xff]  ;;  %v73_v15 = vsel %vm65_vm0, %v420_v12, 0  ;;  %v419_v18 = vld [vmem:[%s599_s1] sm:$0xff]  ;;  %v427_v25 = vld [vmem:[%s601_s3 + $0x18] sm:$0xff]  ;;  %vm97_vm2 = vcmask 519168   ;;  %s315_s14 = sshll.u32 %s603_s5, 4  ;;  %s316_s14 = int_to_ptr.hbm [resolvable:$true] %s315_s14 }
   0x8   :  { %v437_v14 = vld [vmem:[%s601_s3 + $0x68] sm:$0xff]  ;;  %v245_v16 = vsel %vm225_vm1, %v429_v13, 0  ;;  %v428_v19 = vld [vmem:[%s601_s3 + $0x20] sm:$0xff]  ;;  %v70_v21 = vsel %vm65_vm0, %v419_v18, 0  ;;  %v435_v26 = vld [vmem:[%s601_s3 + $0x58] sm:$0xff]  ;;  %v239_v27 = vsel %vm225_vm1, %v427_v25, 0 }
   0x9   :  { %v269_v17 = vsel %vm225_vm1, %v437_v14, 0  ;;  %v436_v20 = vld [vmem:[%s601_s3 + $0x60] sm:$0xff]  ;;  %v242_v22 = vsel %vm225_vm1, %v428_v19, 0  ;;  %v263_v28 = vsel %vm225_vm1, %v435_v26, 0  ;;  %v426_v29 = vld [vmem:[%s601_s3 + $0x10] sm:$0xff]  ;;  %v425_v33 = vld [vmem:[%s601_s3 + $0x8] sm:$0xff] }
   0xa   :  { %v266_v23 = vsel %vm225_vm1, %v436_v20, 0  ;;  %v418_v24 = vld [vmem:[%s598_s0] sm:$0xff]  ;;  %v434_v30 = vld [vmem:[%s601_s3 + $0x50] sm:$0xff]  ;;  %v236_v31 = vsel %vm225_vm1, %v426_v29, 0  ;;  %v433_v34 = vld [vmem:[%s601_s3 + $0x48] sm:$0xff]  ;;  %v233_v35 = vsel %vm225_vm1, %v425_v33, 0 }
   0xb   :  { %86 = vmatpush.bf16.xpose.msra.mxu0 %v76_v9  ;;  %v260_v32 = vsel %vm225_vm1, %v434_v30, 0  ;;  %v257_v36 = vsel %vm225_vm1, %v433_v34, 0  ;;  %v424_v37 = vld [vmem:[%s601_s3] sm:$0xff]  ;;  %s472_s15 = smov 16  }
   0xc   :  { %278 = vmatpush.bf16.xpose.msra.mxu1 %v248_v10  ;;  %v432_v38 = vld [vmem:[%s601_s3 + $0x40] sm:$0xff]  ;;  %v230_v39 = vsel %vm225_vm1, %v424_v37, 0 }
   0xd   :  { %292 = vmatpush.bf16.xpose.msra.mxu2 %v272_v11  ;;  %v254_v40 = vsel %vm225_vm1, %v432_v38, 0  ;;  %v443_v41 = vld [vmem:[%s600_s2] ss:$0 sm:$0xff]  ;;  %s470_s2 = smov [#allocation3]  }
   0xe   :  { %v134_v49 = vld [vmem:[%s602_s4] sm:$0x3]  ;;  %s313_s11 = sshll.u32 %s470_s2, 4  ;;  %s471_s4 = smov 256   ;;  %s314_s11 = int_to_ptr.vmem [resolvable:$true] %s313_s11 }
   0xf   :  { %v136_v50 = vperm.slane %v134_v49, 0  ;;  %v137_v53 = vperm.slane %v134_v49, 1 }
  0x13   :  { %87 = vmatpush.bf16.xpose.msra.mxu0 %v73_v15 }
  0x14   :  { %279 = vmatpush.bf16.xpose.msra.mxu1 %v245_v16 }
  0x15   :  { %293 = vmatpush.bf16.xpose.msra.mxu2 %v269_v17 }
  0x1b   :  { %88 = vmatpush.bf16.xpose.msra.mxu0 %v70_v21 }
  0x1c   :  { %280 = vmatpush.bf16.xpose.msra.mxu1 %v242_v22 }
  0x1d   :  { %294 = vmatpush.bf16.xpose.msra.mxu2 %v266_v23 }
  0x22   :  { %347 = vmatmul.msk.bf16.vlgmr.msra.gmra.mxu0 %vm65_vm0, %v418_v24 }
  0x24   :  { %281 = vmatpush.bf16.xpose.msra.mxu1 %v239_v27 }
  0x25   :  { %295 = vmatpush.bf16.xpose.msra.mxu2 %v263_v28 }
  0x2c   :  { %282 = vmatpush.bf16.xpose.msra.mxu1 %v236_v31 }
  0x2d   :  { %296 = vmatpush.bf16.xpose.msra.mxu2 %v260_v32 }
  0x34   :  { %283 = vmatpush.bf16.xpose.msra.mxu1 %v233_v35 }
  0x35   :  { %297 = vmatpush.bf16.xpose.msra.mxu2 %v257_v36 }
  0x3c   :  { %284 = vmatpush.bf16.xpose.msra.mxu1 %v230_v39 }
  0x3d   :  { %298 = vmatpush.bf16.xpose.msra.mxu2 %v254_v40 }
  0x9f   :  { %v90_v42 = vpop.f32.mrf.mxu0 }
  0xa0   :  { %v91_v43 = vadd.f32 %v443_v41, %v90_v42 }
  0xa2   :  { %v95_v44 = vpack.c.bf16 %v91_v43, %v91_v43 }
  0xa4   :  { %98 = vst.msk [vmem:[#allocation2] sm:$0xf] %vm97_vm2, %v95_v44 }
  0xa7   :  { %v92_v45 = vpop.f32.mrf.mxu0 }
  0xa8   :  { %v93_v46 = vadd.f32 %v443_v41, %v92_v45 }
  0xaa   :  { %v96_v47 = vpack.c.bf16 %v93_v46, %v93_v46 }
  0xac   :  { %99 = vst.msk [vmem:[#allocation2 + $0x4] sm:$0xf] %vm97_vm2, %v96_v47 }
  0xb3   :  { %v423_v48 = vld [vmem:[#allocation2] sm:$0xff] }
  0xb4   :  { %416 = vmatmul.msk.bf16.vlgmr.msra.gmra.mxu1 %vm225_vm1, %v423_v48  ;;  %417 = vmatmul.msk.bf16.vlgmr.msra.gmra.mxu2 %vm225_vm1, %v423_v48 }
 0x131   :  { %v286_v51 = vpop.f32.mrf.mxu1 }
 0x132   :  { %v287_v52 = vadd.f32 %v286_v51, %v136_v50 }
 0x134   :  { %305 = vst [vmem:[#allocation3] sm:$0xff] %v287_v52 }
 0x137   :  { %v300_v54 = vpop.f32.mrf.mxu2 }
 0x138   :  { %v301_v55 = vadd.f32 %v300_v54, %v137_v53 }
 0x139   :  { %v288_v56 = vpop.f32.mrf.mxu1 }
 0x13a   :  { %306 = vst [vmem:[#allocation3 + $0x8] sm:$0xff] %v301_v55  ;;  %v289_v57 = vadd.f32 %v288_v56, %v136_v50 }
 0x13c   :  { %307 = vst [vmem:[#allocation3 + $0x10] sm:$0xff] %v289_v57 }
 0x13f   :  { %v302_v58 = vpop.f32.mrf.mxu2 }
 0x140   :  { %v303_v59 = vadd.f32 %v302_v58, %v137_v53 }
 0x142   :  { %308 = vst [vmem:[#allocation3 + $0x18] sm:$0xff] %v303_v59 }
 0x143   :  { %321 = dma.vmem_to_hbm [thread:$0]  %s314_s11, 512, %s316_s14, [#allocation4], %s471_s4, %s471_s4, %s472_s15  }
 0x144   :  { %468 = dma.done.wait [#allocation4], 512  }
 0x145   :  { %469 = vsyncadd [#allocation4], 4294966784 }
 0x146   :  { %326 = vsyncpa [#allocation4], 1 }

</bundles_post_ra>
